<compile_context>
chip_gen: v6e
topology: v6e:2x2x1
jax: 0.10.0
libtpu: 0.0.40
codegen_flags: <defaults>
</compile_context>

<pallas_src>
import jax
import jax.numpy as jnp
import numpy as np
from jax.experimental import pallas as pl
from jax.experimental.pallas import tpu as pltpu

ITERATIONS = 5


def _round_up(v, m):
    return (v + m - 1) // m * m


def _vmem_capacity_bytes():
    try:
        info = pltpu.get_tpu_info()
        cap = getattr(info, "vmem_capacity_bytes", None)
        if cap:
            return int(cap)
    except Exception:
        pass
    return 64 * 1024 * 1024   # conservative default (v7x per-TensorCore VMEM)


def _tensorcores_per_device():
    # v4/v5p (megacore) and v7x expose 2 TensorCores behind one device and
    # shard "parallel" grid axes across them; v2/v3/v5e/v6e are 1 TC/device.
    try:
        kind = jax.devices()[0].device_kind.lower()
    except Exception:
        return 1
    if any(s in kind for s in ("lite", "v2", "v3", "v5e", "v6")):
        return 1
    return 2


def momentum_kernel(idx_ref, x_ref, y_ref, ay_ref, sy_ref, out_ref, sx_acc):
    k = pl.program_id(2)                      # N-reduction step ("arbitrary")

    @pl.when(k == 0)
    def _():
        sx_acc[...] = jnp.zeros_like(sx_acc)

    tile_g = sx_acc.shape[0]
    tile_n = idx_ref.shape[1]
    g_base = pl.program_id(0) * tile_g        # G-tile base for the one-hot ids

    # Build the scatter mask directly in bf16 from the raw int32 index
    # (padded rows carry index == -1 and never match; the compare runs in
    # int32 so there is exactly one dtype conversion and no f32 mask).
    idx = idx_ref[...]                                               # (1, tile_n)
    gids = jax.lax.broadcasted_iota(jnp.int32, (tile_g, tile_n), 0) + g_base
    mask = (gids == idx).astype(jnp.bfloat16)                        # exact 0/1

    # Scatter-sum of x into groups via a bf16 one-hot matmul on the MXU,
    # accumulated in f32 across the N tiles.
    sx_acc[...] += jnp.dot(mask, x_ref[...], preferred_element_type=jnp.float32)

    # Finalize: the 5 Nesterov-momentum steps are linear in (y0, sx), so the
    # whole loop collapses to one per-group affine update.  ay/sy were
    # precomputed from the per-group counts in the wrapper (tiny O(G) work).
    @pl.when(k == pl.num_programs(2) - 1)
    def _():
        out_ref[...] = ay_ref[...] * y_ref[...] + sy_ref[...] * sx_acc[...]


def momentum_optimizer(x, y0, index, lr_param, mom_param, num_groups,
                       iterations=ITERATIONS):
    n, d = x.shape
    g = num_groups
    index = index.astype(jnp.int32)

    n_tc = _tensorcores_per_device()
    vmem_cap = _vmem_capacity_bytes()
    vmem_budget = int(min(vmem_cap * 3 // 4, 112 * 1024 * 1024))

    # ---- tile sizing --------------------------------------------------------
    d_pad = _round_up(max(d, 1), 128)            # lane-dense feature axis
    # Group axis: one tile while small; MXU-M-aligned 256-row tiles for large
    # group counts (also provides extra parallel tiles for 2-TC parts).
    g_pad = _round_up(max(g, 1), 8)
    if g_pad > 512:
        g_pad = _round_up(g, 256)
        tile_g = 256
    else:
        tile_g = g_pad
    # Contraction axis: big tiles -> big x DMAs and few grid steps (the kernel
    # is HBM-bound streaming x, so DMA block size is the dominant lever).
    if n > 512:
        tile_n = 512
        n_pad = _round_up(n, 512)
    else:
        n_pad = _round_up(max(n, 1), 128)
        tile_n = n_pad

    def vmem_bytes(tile_d):
        x_blk = 2 * tile_n * tile_d * 2          # bf16 x, double-buffered
        y_blk = 2 * tile_g * tile_d * 4          # y0 resident through reduction
        o_blk = 2 * tile_g * tile_d * 4          # output block
        acc = tile_g * tile_d * 4                # sx accumulator scratch
        msk = 2 * tile_g * tile_n * 4            # in-kernel iota/compare/mask temps
        idx_blk = 2 * tile_n * 4
        coef = 2 * 2 * tile_g * 4
        return x_blk + y_blk + o_blk + acc + msk + idx_blk + coef

    # Largest feature tile (multiple of 128, dividing d_pad, <= 2048) that fits
    # the per-generation VMEM budget; force >= 2 D tiles on 2-TC parts so both
    # TensorCores get work (harmless no-op when d_pad == 128).
    min_d_tiles = 2 if (n_tc >= 2 and d_pad >= 256) else 1
    tile_d = 128
    for t in range(min(d_pad, 2048), 0, -128):
        if d_pad % t != 0:
            continue
        if d_pad // t < min_d_tiles:
            continue
        if vmem_bytes(t) * 5 // 4 <= vmem_budget:
            tile_d = t
            break

    grid = (g_pad // tile_g, d_pad // tile_d, n_pad // tile_n)

    # ---- operand padding (skipped when already aligned) ---------------------
    if n == n_pad and d == d_pad:
        x_p = x.astype(jnp.bfloat16)
    else:
        x_p = jnp.zeros((n_pad, d_pad), jnp.bfloat16).at[:n, :d].set(
            x.astype(jnp.bfloat16))
    if g == g_pad and d == d_pad:
        y_p = y0.astype(jnp.float32)
    else:
        y_p = jnp.zeros((g_pad, d_pad), jnp.float32).at[:g, :d].set(
            y0.astype(jnp.float32))
    if n == n_pad:
        idx_p = index.reshape(1, n)
    else:
        idx_p = jnp.full((1, n_pad), -1, jnp.int32).at[0, :n].set(index)

    # ---- per-group momentum coefficients (tiny O(G) wrapper work) -----------
    # grad = count*y - sx ; buf' = mom*buf - lr*grad ; y' = y + buf' is linear
    # in (y0, sx), so y_final = ay(count)*y0 + sy(count)*sx per group.
    lr = jax.nn.softplus(jnp.asarray(lr_param, jnp.float32))    # stable form
    mom = jax.nn.sigmoid(jnp.asarray(mom_param, jnp.float32))
    count = jnp.zeros((g,), jnp.float32).at[index].add(1.0)
    count_p = jnp.zeros((g_pad, 1), jnp.float32).at[:g, 0].set(count)
    lrc = lr * count_p
    ay = jnp.ones_like(count_p)
    ab = jnp.zeros_like(count_p)
    sy = jnp.zeros_like(count_p)
    sb = jnp.zeros_like(count_p)
    for _ in range(iterations):
        ab = mom * ab - lrc * ay
        ay = ay + ab
        sb = mom * sb - lrc * sy + lr
        sy = sy + sb

    out = pl.pallas_call(
        momentum_kernel,
        out_shape=jax.ShapeDtypeStruct((g_pad, d_pad), jnp.float32),
        grid=grid,
        in_specs=[
            pl.BlockSpec((1, tile_n), lambda gi, j, k: (0, k)),        # index
            pl.BlockSpec((tile_n, tile_d), lambda gi, j, k: (k, j)),   # x
            pl.BlockSpec((tile_g, tile_d), lambda gi, j, k: (gi, j)),  # y0
            pl.BlockSpec((tile_g, 1), lambda gi, j, k: (gi, 0)),       # ay coef
            pl.BlockSpec((tile_g, 1), lambda gi, j, k: (gi, 0)),       # sy coef
        ],
        out_specs=pl.BlockSpec((tile_g, tile_d), lambda gi, j, k: (gi, j)),
        scratch_shapes=[pltpu.VMEM((tile_g, tile_d), jnp.float32)],    # sx acc
        compiler_params=pltpu.CompilerParams(
            dimension_semantics=("parallel", "parallel", "arbitrary"),
            vmem_limit_bytes=vmem_budget),
    )(idx_p, x_p, y_p, ay, sy)
    return out[:g, :d]


def _reference(x, y0, index, lr_param, mom_param, num_groups,
               iterations=ITERATIONS):
    # Pure numpy version of the original unrolled forward (quadratic energy).
    x = np.asarray(x, np.float32)
    y = np.asarray(y0, np.float32).copy()
    idx = np.asarray(index)
    lr = np.float32(np.logaddexp(np.float32(lr_param), np.float32(0.0)))  # stable softplus
    mom = np.float32(1.0 / (1.0 + np.exp(-np.float32(mom_param))))
    g = num_groups
    sx = np.zeros_like(y)
    count = np.zeros((g, 1), np.float32)
    for i in range(x.shape[0]):
        sx[idx[i]] += x[i]
        count[idx[i], 0] += 1.0
    buf = np.zeros_like(y)
    for _ in range(iterations):
        grad = count * y - sx
        buf = mom * buf - lr * grad
        y = y + buf
    return y


if __name__ == "__main__":
    def run_case(key, n, d, g, lr_param, mom_param):
        k1, k2, k3 = jax.random.split(key, 3)
        x = jax.random.normal(k1, (n, d), dtype=jnp.float32)
        y0 = jax.random.normal(k2, (g, d), dtype=jnp.float32)
        index = jax.random.randint(k3, (n,), 0, g, dtype=jnp.int32)
        out = momentum_optimizer(x, y0, index, lr_param, mom_param, g)
        out = jax.block_until_ready(out)
        # The kernel streams x in bf16 through the MXU (f32 accumulate); feed
        # the reference the same bf16-rounded x so the comparison isolates f32
        # rounding order.
        x_q = np.asarray(x.astype(jnp.bfloat16).astype(jnp.float32))
        ref = _reference(x_q, np.asarray(y0), np.asarray(index),
                         lr_param, mom_param, g)
        np.testing.assert_allclose(np.asarray(out), ref, rtol=2e-3, atol=2e-3)

    key = jax.random.PRNGKey(0)
    k_a, k_b = jax.random.split(key)
    # Small, deliberately non-aligned shapes (single-tile path, N/D/G padding).
    run_case(k_a, n=32, d=24, g=12, lr_param=0.1, mom_param=0.9)
    # Multi-tile path: several N-reduction tiles, >1 feature tile on 2-TC parts.
    run_case(k_b, n=700, d=160, g=200, lr_param=-2.0, mom_param=0.0)
    print("KERNEL_OK")
</pallas_src>

<mosaic_0001>
module attributes {stable_mosaic.version = 11 : i64} {
  func.func @momentum_kernel(%arg0: i32, %arg1: i32, %arg2: i32, %arg3: memref<1x128xi32, #tpu.memory_space<vmem>>, %arg4: memref<128x128xbf16, #tpu.memory_space<vmem>>, %arg5: memref<16x128xf32, #tpu.memory_space<vmem>>, %arg6: memref<16x1xf32, #tpu.memory_space<vmem>>, %arg7: memref<16x1xf32, #tpu.memory_space<vmem>>, %arg8: memref<16x128xf32, #tpu.memory_space<vmem>>, %arg9: memref<16x128xf32, #tpu.memory_space<vmem>>) attributes {dimension_semantics = [#tpu.dimension_semantics<parallel>, #tpu.dimension_semantics<parallel>, #tpu.dimension_semantics<arbitrary>], iteration_bounds = array<i64: 1, 1, 1>, scalar_prefetch = 0 : i64, scratch_operands = 1 : i64, tpu.core_type = #tpu.core_type<tc>, window_params = [{transform_indices = @transform_0, window_bounds = array<i64: 1, 128>}, {transform_indices = @transform_1, window_bounds = array<i64: 128, 128>}, {transform_indices = @transform_2, window_bounds = array<i64: 16, 128>}, {transform_indices = @transform_3, window_bounds = array<i64: 16, 1>}, {transform_indices = @transform_4, window_bounds = array<i64: 16, 1>}, {transform_indices = @transform_5, window_bounds = array<i64: 16, 128>}]} {
    %c0_i32 = arith.constant 0 : i32
    %0 = arith.cmpi eq, %arg2, %c0_i32 : i32
    %1 = arith.extui %0 : i1 to i32
    %c0_i32_0 = arith.constant 0 : i32
    %2 = arith.cmpi ne, %1, %c0_i32_0 : i32
    scf.if %2 {
      %cst_10 = arith.constant 0.000000e+00 : f32
      %21 = vector.broadcast %cst_10 : f32 to vector<16x128xf32>
      %c0_11 = arith.constant 0 : index
      %c0_12 = arith.constant 0 : index
      %22 = vector.load %arg9[%c0_11, %c0_12] : memref<16x128xf32, #tpu.memory_space<vmem>>, vector<16x128xf32>
      tpu.vector_store %arg9[%c0_11, %c0_12], %21 {strides = array<i32>} : memref<16x128xf32, #tpu.memory_space<vmem>>, vector<16x128xf32>,
    } else {
    }
    %c16_i32 = arith.constant 16 : i32
    %3 = arith.muli %arg0, %c16_i32 : i32
    %c0 = arith.constant 0 : index
    %c0_1 = arith.constant 0 : index
    %4 = vector.load %arg3[%c0, %c0_1] : memref<1x128xi32, #tpu.memory_space<vmem>>, vector<1x128xi32>
    %5 = tpu.iota {dimensions = array<i32: 0>} : vector<16x128xi32>
    %6 = vector.broadcast %3 : i32 to vector<16x128xi32>
    %7 = arith.addi %5, %6 : vector<16x128xi32>
    %8 = vector.broadcast %4 : vector<1x128xi32> to vector<16x128xi32>
    %9 = arith.cmpi eq, %7, %8 : vector<16x128xi32>
    %10 = arith.extui %9 : vector<16x128xi1> to vector<16x128xi32>
    %11 = arith.sitofp %10 : vector<16x128xi32> to vector<16x128xf32>
    %12 = arith.truncf %11 : vector<16x128xf32> to vector<16x128xbf16>
    %c0_2 = arith.constant 0 : index
    %c0_3 = arith.constant 0 : index
    %13 = vector.load %arg9[%c0_2, %c0_3] : memref<16x128xf32, #tpu.memory_space<vmem>>, vector<16x128xf32>
    %c0_4 = arith.constant 0 : index
    %c0_5 = arith.constant 0 : index
    %14 = vector.load %arg4[%c0_4, %c0_5] : memref<128x128xbf16, #tpu.memory_space<vmem>>, vector<128x128xbf16>
    %cst = arith.constant dense<0.000000e+00> : vector<16x128xf32>
    %15 = tpu.matmul %12, %14, %cst {dimension_numbers = #tpu.dot_dimension_numbers<[1], [0], [0], [1], [0, 0, 1, 1], [], []>} : vector<16x128xbf16>, vector<128x128xbf16>, vector<16x128xf32> -> vector<16x128xf32>
    %16 = arith.addf %13, %15 : vector<16x128xf32>
    %c0_6 = arith.constant 0 : index
    %c0_7 = arith.constant 0 : index
    %17 = vector.load %arg9[%c0_6, %c0_7] : memref<16x128xf32, #tpu.memory_space<vmem>>, vector<16x128xf32>
    tpu.vector_store %arg9[%c0_6, %c0_7], %16 {strides = array<i32>} : memref<16x128xf32, #tpu.memory_space<vmem>>, vector<16x128xf32>,
    %c0_i32_8 = arith.constant 0 : i32
    %18 = arith.cmpi eq, %arg2, %c0_i32_8 : i32
    %19 = arith.extui %18 : i1 to i32
    %c0_i32_9 = arith.constant 0 : i32
    %20 = arith.cmpi ne, %19, %c0_i32_9 : i32
    scf.if %20 {
      %c0_10 = arith.constant 0 : index
      %c0_11 = arith.constant 0 : index
      %21 = vector.load %arg6[%c0_10, %c0_11] : memref<16x1xf32, #tpu.memory_space<vmem>>, vector<16x1xf32>
      %c0_12 = arith.constant 0 : index
      %c0_13 = arith.constant 0 : index
      %22 = vector.load %arg5[%c0_12, %c0_13] : memref<16x128xf32, #tpu.memory_space<vmem>>, vector<16x128xf32>
      %23 = vector.broadcast %21 : vector<16x1xf32> to vector<16x128xf32>
      %24 = arith.mulf %23, %22 : vector<16x128xf32>
      %c0_14 = arith.constant 0 : index
      %c0_15 = arith.constant 0 : index
      %25 = vector.load %arg7[%c0_14, %c0_15] : memref<16x1xf32, #tpu.memory_space<vmem>>, vector<16x1xf32>
      %c0_16 = arith.constant 0 : index
      %c0_17 = arith.constant 0 : index
      %26 = vector.load %arg9[%c0_16, %c0_17] : memref<16x128xf32, #tpu.memory_space<vmem>>, vector<16x128xf32>
      %27 = vector.broadcast %25 : vector<16x1xf32> to vector<16x128xf32>
      %28 = arith.mulf %27, %26 : vector<16x128xf32>
      %29 = arith.addf %24, %28 : vector<16x128xf32>
      %c0_18 = arith.constant 0 : index
      %c0_19 = arith.constant 0 : index
      %30 = vector.load %arg8[%c0_18, %c0_19] : memref<16x128xf32, #tpu.memory_space<vmem>>, vector<16x128xf32>
      tpu.vector_store %arg8[%c0_18, %c0_19], %29 {strides = array<i32>} : memref<16x128xf32, #tpu.memory_space<vmem>>, vector<16x128xf32>,
    } else {
    }
    return
  }
  func.func @transform_0(%arg0: i32, %arg1: i32, %arg2: i32) -> (i32, i32) {
    %c0_i32 = arith.constant 0 : i32
    %c0_i32_0 = arith.constant 0 : i32
    return %c0_i32, %arg2 : i32, i32
  }
  func.func @transform_1(%arg0: i32, %arg1: i32, %arg2: i32) -> (i32, i32) {
    %c0_i32 = arith.constant 0 : i32
    return %arg2, %arg1 : i32, i32
  }
  func.func @transform_2(%arg0: i32, %arg1: i32, %arg2: i32) -> (i32, i32) {
    %c0_i32 = arith.constant 0 : i32
    return %arg0, %arg1 : i32, i32
  }
  func.func @transform_3(%arg0: i32, %arg1: i32, %arg2: i32) -> (i32, i32) {
    %c0_i32 = arith.constant 0 : i32
    %c0_i32_0 = arith.constant 0 : i32
    return %arg0, %c0_i32 : i32, i32
  }
  func.func @transform_4(%arg0: i32, %arg1: i32, %arg2: i32) -> (i32, i32) {
    %c0_i32 = arith.constant 0 : i32
    %c0_i32_0 = arith.constant 0 : i32
    return %arg0, %c0_i32 : i32, i32
  }
  func.func @transform_5(%arg0: i32, %arg1: i32, %arg2: i32) -> (i32, i32) {
    %c0_i32 = arith.constant 0 : i32
    return %arg0, %arg1 : i32, i32
  }
}

</mosaic_0001>

<bundles_post_ra>
// kernel: tpu_custom_call.1
= control target key start
LH: loop header
LB: loop body
LE: loop exit
PB: predicated region body
PF: predicated region fallthrough
CT: control target
= control target key end

     0   :  { %10 = vsyncpa [#allocation4], 0  ;;  %s401_s0 = inlined_call_operand.vmem [shape: s32[1,128], index: 0, kind: input, shape index: {}]   ;;  %s402_s1 = inlined_call_operand.hbm [shape: bf16[128,128], index: 1, kind: input, shape index: {}]   ;;  %s403_s2 = inlined_call_operand.vmem [shape: f32[16,128], index: 2, kind: input, shape index: {}]   ;;  %s404_s3 = inlined_call_operand.vmem [shape: f32[16,1], index: 3, kind: input, shape index: {}]   ;;  %s405_s4 = inlined_call_operand.vmem [shape: f32[16,1], index: 4, kind: input, shape index: {}]   ;;  %s406_s5 = inlined_call_operand.hbm [shape: f32[16,128], index: 5, kind: output, shape index: {}]  }
   0x1   :  { %11 = vsyncpa [#allocation5], 0  ;;  %s334_s18 = smov [#allocation3]  }
   0x2   :  { %s19_s19 = sshll.u32 %s334_s18, 4  ;;  %s20_s19 = int_to_ptr.vmem [resolvable:$true] %s19_s19 }
   0x3   :  { %s298_s20 = scalar_lea.vmem %s20_s19, 1024  ;;  %p303_p1 = scmp.lt.s32.totalorder %s20_s19, %s20_s19 }
   0x4   :  { %p299_p0 = scmp.ne.s32.totalorder %s20_s19, %s298_s20  ;;  %p304_p2 = scmp.lt.s32.totalorder %s298_s20, %s298_s20 }
   0x6   :  { %p305_p3 = por %p304_p2, %p303_p1 }
   0x8   :  { %p306_p4 = pnand %p305_p3, %p299_p0 }
   0xa   :  { %309 = shalt.err (!%p306_p4)
}
   0xb   :  { %s335_s21 = smov 64   ;;  %s336_s22 = smov 4  }
   0xc   :  { %25 = dma.hbm_to_vmem [thread:$0]  %s402_s1, 1024, %s20_s19, [#allocation4], %s335_s21, %s335_s21, %s336_s22  }
   0xd   :  { %330 = dma.done.wait [#allocation4], 1024  }
   0xe   :  { %331 = vsyncadd [#allocation4], 4294966272  ;;  %v337_v0 = vmov 0.0   ;;  %vm338_vm0 = vmmov 0   ;;  %v339_v1 = vmov 0   ;;  %v282_v2 = vld [vmem:[#allocation3 + $0x38] sm:$0xff]   ;;  %v44_v11 = vlaneseq }
   0xf   :  { %250 = vmatprep.subr.bf16.mxu0 %v337_v0  ;;  %266 = vmatprep.mubr.msk.bf16.mxu0 %vm338_vm0, %v337_v0  ;;  %v283_v3 = vld [vmem:[#allocation3 + $0x30] sm:$0xff]   ;;  %v284_v4 = vld [vmem:[#allocation3 + $0x28] sm:$0xff]   ;;  %v191_v5 = vld [vmem:[%s405_s4] sm:$0xff]  ;;  %v340_v18 = vmov 1.0|1.0   ;;  %s341_s10 = smov [#allocation6]  }
  0x10   :  { %281 = vset.pattern.permute.xlu1 %v339_v1  ;;  %280 = vset.pattern.permute.xlu0 %v339_v1  ;;  %v175_v6 = vld [vmem:[%s404_s3] sm:$0xff]  ;;  %v192_v8 = vld [vmem:[%s405_s4 + $0x8] sm:$0xff]  ;;  %v286_v10 = vld [vmem:[#allocation3 + $0x18] sm:$0xff]   ;;  %v45_v13 = vshrl.u32 %v44_v11, 7  ;;  %s216_s11 = sshll.u32 %s341_s10, 4  ;;  %s217_s11 = int_to_ptr.vmem [resolvable:$true] %s216_s11 }
  0x11   :  { %251 = vmatpush3.bf16.msra.mxu0 %v282_v2  ;;  %197 = vperm.xlu1 %281, %v191_v5   ;;  %v285_v7 = vld [vmem:[#allocation3 + $0x20] sm:$0xff]   ;;  %v176_v9 = vld [vmem:[%s404_s3 + $0x8] sm:$0xff]  ;;  %v287_v12 = vld [vmem:[#allocation3 + $0x10] sm:$0xff]   ;;  %s310_s12 = scalar_lea.vmem %s217_s11, 256  ;;  %p315_p6 = scmp.lt.s32.totalorder %s217_s11, %s217_s11 }
  0x12   :  { %252 = vmatprep.subr.bf16.mxu0 %v337_v0  ;;  %181 = vperm.xlu0 %280, %v175_v6   ;;  %v288_v14 = vld [vmem:[#allocation3 + $0x8] sm:$0xff]   ;;  %v46_v15 = vadd.s32 8, %v45_v13  ;;  %v228_v16 = vld [vmem:[%s401_s0] ss:$0 sm:$0xff]  ;;  %p311_p5 = scmp.ne.s32.totalorder %s217_s11, %s310_s12  ;;  %p316_p7 = scmp.lt.s32.totalorder %s310_s12, %s310_s12 }
  0x13   :  { %v289_v17 = vld [vmem:[#allocation3] sm:$0xff]   ;;  %vm54_vm1 = vcmp.eq.s32.totalorder %v45_v13, %v228_v16  ;;  %v178_v25 = vld [vmem:[%s403_s2 + $0x8] sm:$0xff] }
  0x14   :  { %vm55_vm2 = vcmp.eq.s32.totalorder %v46_v15, %v228_v16  ;;  %v177_v19 = vld [vmem:[%s403_s2] sm:$0xff]  ;;  %p317_p8 = por %p316_p7, %p315_p6 }
  0x15   :  { %253 = vmatpush3.bf16.msra.mxu0 %v283_v3  ;;  %202 = vperm.xlu1 %281, %v192_v8   ;;  %vm239_vm3 = vmpackc.low %vm55_vm2, %vm54_vm1 }
  0x16   :  { %254 = vmatprep.subr.bf16.mxu0 %v337_v0  ;;  %186 = vperm.xlu0 %280, %v176_v9   ;;  %p318_p9 = pnand %p317_p8, %p311_p5 }
  0x19   :  { %255 = vmatpush3.bf16.msra.mxu0 %v284_v4 }
  0x1a   :  { %256 = vmatprep.subr.bf16.mxu0 %v337_v0 }
  0x1d   :  { %257 = vmatpush3.bf16.msra.mxu0 %v285_v7 }
  0x1e   :  { %258 = vmatprep.subr.bf16.mxu0 %v337_v0 }
  0x21   :  { %259 = vmatpush3.bf16.msra.mxu0 %v286_v10 }
  0x22   :  { %260 = vmatprep.subr.bf16.mxu0 %v337_v0 }
  0x25   :  { %261 = vmatpush3.bf16.msra.mxu0 %v287_v12 }
  0x26   :  { %262 = vmatprep.subr.bf16.mxu0 %v337_v0 }
  0x29   :  { %263 = vmatpush3.bf16.msra.mxu0 %v288_v14 }
  0x2a   :  { %264 = vmatprep.subr.bf16.mxu0 %v337_v0 }
  0x2d   :  { %265 = vmatpush3.bf16.msra.mxu0 %v289_v17 }
  0x30   :  { %267 = vmatmul.mubr.msk.bf16.vlgmr.msra.gmra.mxu0 %vm239_vm3, %v340_v18 }
  0x8c   :  { %v198_v21 = vpop.permute.xlu1 %197 }
  0x8d   :  { %v182_v20 = vpop.permute.xlu0 %181 }
  0x8e   :  { %v189_v22 = vmul.f32 %v182_v20, %v177_v19 }
  0x90   :  { %v203_v29 = vpop.permute.xlu1 %202 }
  0x91   :  { %v187_v26 = vpop.permute.xlu0 %186 }
  0x92   :  { %v190_v31 = vmul.f32 %v187_v26, %v178_v25 }
  0xf0   :  { %v161_v23 = vpop.f32.mrf.mxu0 }
  0xf1   :  { %v205_v24 = vmul.f32 %v198_v21, %v161_v23 }
  0xf2   :  { %v268_v27 = vpop.f32.mrf.mxu0 }
  0xf3   :  { %v207_v28 = vadd.f32 %v205_v24, %v189_v22 }
  0xf4   :  { %v164_v30 = vpop.f32.mrf.mxu0 }
  0xf5   :  { %209 = vst [vmem:[#allocation6] sm:$0xff] %v207_v28  ;;  %v206_v32 = vmul.f32 %v203_v29, %v164_v30 }
  0xf6   :  { %v269_v33 = vpop.f32.mrf.mxu0 }
  0xf7   :  { %v208_v34 = vadd.f32 %v206_v32, %v190_v31 }
  0xf9   :  { %210 = vst [vmem:[#allocation6 + $0x8] sm:$0xff] %v208_v34 }
  0xfa   :  { %321 = shalt.err (!%p318_p9)
}
  0xfb   :  { %s342_s2 = smov 128   ;;  %s343_s13 = smov 8  }
  0xfc   :  { %222 = dma.vmem_to_hbm [thread:$0]  %s217_s11, 256, %s406_s5, [#allocation5], %s342_s2, %s342_s2, %s343_s13  }
  0xfd   :  { %332 = dma.done.wait [#allocation5], 256  }
  0xfe   :  { %333 = vsyncadd [#allocation5], 4294967040 }
  0xff   :  { %226 = vsyncpa [#allocation4], 1 }
 0x100   :  { %227 = vsyncpa [#allocation5], 1 }

</bundles_post_ra>
